<compile_context>
chip_gen: v5e
topology: v5e:2x2
jax: 0.10.0
libtpu: 0.0.40
codegen_flags: <defaults>
</compile_context>

<pallas_src>
import functools

import jax
import jax.numpy as jnp
from jax.experimental import pallas as pl
from jax.experimental.pallas import tpu as pltpu


def _round_up(x, m):
    return ((x + m - 1) // m) * m


def _location_loss_kernel(pred_ref, loc_ref, out_ref, acc_ref, *,
                          two_n, tn, sx, sy, inv_count, mask_cols, acc_width):
    """One (tb, tn) tile: normalize, |diff|, fold into acc; finalize at last j."""
    j = pl.program_id(1)

    pred = pred_ref[...]                                   # (tb, tn) f32
    loc = loc_ref[...]                                     # (tb, tn) f32

    # Alternating [2/w, 2/h, ...] normalization scale as compile-time immediates
    # (xy pairs are interleaved along the lane axis after the [B, 2N] reshape).
    lane = jax.lax.broadcasted_iota(jnp.int32, pred.shape, 1)
    scale = jnp.where((lane & 1) == 0, sx, sy)
    diff = jnp.abs(pred - (loc * scale - 1.0))

    if mask_cols:
        # Ragged last reduction block: out-of-range columns hold stale VMEM data.
        # Use a select (NOT a 0/1 multiply) so NaN/Inf garbage cannot propagate.
        col = j * tn + lane
        diff = jnp.where(col < two_n, diff, 0.0)

    @pl.when(j == 0)
    def _():
        acc_ref[...] = jnp.zeros_like(acc_ref)

    if acc_width == 128:
        # Fold the tn/128 lane-aligned chunks with pure VALU adds; keeps the
        # per-step accumulator store full lane-width (no vst.msk) and defers
        # the single cross-lane (XLU) reduction to the last step.
        folded = diff[:, 0:128]
        for c in range(1, tn // 128):
            folded = folded + diff[:, c * 128:(c + 1) * 128]
        acc_ref[...] += folded
    else:
        # tn == full (non-128-aligned) extent: single step, reduce directly.
        acc_ref[...] += jnp.sum(diff, axis=1, keepdims=True)

    # Store the per-batch loss once, at the final reduction step.
    @pl.when(j == pl.num_programs(1) - 1)
    def _():
        if acc_width == 128:
            out_ref[...] = jnp.sum(acc_ref[...], axis=1, keepdims=True) * inv_count
        else:
            out_ref[...] = acc_ref[...] * inv_count


def location_loss(pred_locations, locations, w=384.0, h=160.0):
    """Pallas TPU implementation of LocationLoss.forward.

    pred_locations: [B, N, 2] float32 (normalized predictions)
    locations:      [B, N, 2] float32 (pixel coordinates)
    returns:        [B] float32
    """
    assert pred_locations.shape == locations.shape
    b, n, d = pred_locations.shape
    assert d == 2
    two_n = 2 * n

    # Lane-dense layout: xy interleaved along the (fast) lane axis.
    pred2 = pred_locations.astype(jnp.float32).reshape(b, two_n)
    loc2 = locations.astype(jnp.float32).reshape(b, two_n)

    # ---- Reduction-axis (lane) tiling: never pad to a multiple of tn. ----
    if two_n % 128 == 0:
        tn = min(2048, two_n)           # 128-aligned blocks; ragged last block OK
        two_n_arr = two_n
    elif two_n <= 16384:
        tn = two_n                      # full-extent block: no pad, single step
        two_n_arr = two_n
    else:
        # Rare: very large, non-128-aligned 2N. One cheap pad to the next
        # multiple of 128 (<= 127 extra columns) so blocks stay 128-aligned.
        two_n_arr = _round_up(two_n, 128)
        pad = two_n_arr - two_n
        pred2 = jnp.pad(pred2, ((0, 0), (0, pad)))
        loc2 = jnp.pad(loc2, ((0, 0), (0, pad)))
        tn = 2048

    mask_cols = (two_n_arr != two_n) or (two_n % tn != 0)

    # ---- Batch-axis tiling (multiple of 8, ragged last block allowed). ----
    if b % 8 == 0:
        tb = min(512, b)
    elif b < 8:
        tb = b                          # full-dim block (allowed for tiny B)
    else:
        tb = min(512, (b // 8) * 8)     # multiple of 8; ragged last block
    # Keep >= 2 batch blocks when possible so both v7x TensorCores get work.
    if b >= 16:
        tb = min(tb, _round_up((b + 1) // 2, 8))
    # Keep one double-buffered input block under ~4 MiB of VMEM.
    max_block_bytes = 4 * 1024 * 1024
    if tb > 8 and tb * tn * 4 > max_block_bytes:
        tb = max(8, (max_block_bytes // (tn * 4)) // 8 * 8)

    grid = (pl.cdiv(b, tb), pl.cdiv(two_n_arr, tn))
    acc_width = 128 if tn % 128 == 0 else 1

    kernel = functools.partial(
        _location_loss_kernel,
        two_n=two_n,
        tn=tn,
        sx=2.0 / float(w),
        sy=2.0 / float(h),
        inv_count=1.0 / float(two_n),
        mask_cols=mask_cols,
        acc_width=acc_width,
    )

    out = pl.pallas_call(
        kernel,
        out_shape=jax.ShapeDtypeStruct((b, 1), jnp.float32),
        grid_spec=pltpu.PrefetchScalarGridSpec(
            num_scalar_prefetch=0,
            grid=grid,
            in_specs=[
                pl.BlockSpec((tb, tn), lambda i, j: (i, j)),
                pl.BlockSpec((tb, tn), lambda i, j: (i, j)),
            ],
            out_specs=pl.BlockSpec((tb, 1), lambda i, j: (i, 0)),
            scratch_shapes=[pltpu.VMEM((tb, acc_width), jnp.float32)],
        ),
        compiler_params=pltpu.CompilerParams(
            dimension_semantics=("parallel", "arbitrary"),
            vmem_limit_bytes=48 * 1024 * 1024,
        ),
    )(pred2, loc2)

    return out[:, 0]


def _reference(pred_locations, locations, w=384.0, h=160.0):
    img = jnp.array([w, h], dtype=jnp.float32)
    loc = locations / (0.5 * img) - 1.0
    return jnp.mean(jnp.abs(pred_locations - loc), axis=(1, 2))


if __name__ == "__main__":
    key = jax.random.PRNGKey(0)
    ks = jax.random.split(key, 6)
    W, H = 384.0, 160.0
    img = jnp.array([W, H], dtype=jnp.float32)

    # Small shape implied by the module: B=2 batches, N=8 locations, xy.
    B, N = 2, 8
    pred = jax.random.normal(ks[0], (B, N, 2), dtype=jnp.float32)
    loc = jax.random.uniform(ks[1], (B, N, 2), dtype=jnp.float32) * img
    out = jax.block_until_ready(location_loss(pred, loc, w=W, h=H))
    ref = _reference(pred, loc, w=W, h=H)
    assert out.shape == (B,)
    assert jnp.allclose(out, ref, atol=1e-5, rtol=1e-5), (out, ref)

    # Non-128-aligned 2N (1200): full-extent reduction block, ragged batch
    # blocks (b=12 -> tb=8, two batch blocks), no wrapper padding.
    B2, N2 = 12, 600
    pred2 = jax.random.normal(ks[2], (B2, N2, 2), dtype=jnp.float32)
    loc2 = jax.random.uniform(ks[3], (B2, N2, 2), dtype=jnp.float32) * img
    out2 = jax.block_until_ready(location_loss(pred2, loc2, w=W, h=H))
    ref2 = _reference(pred2, loc2, w=W, h=H)
    assert out2.shape == (B2,)
    assert jnp.allclose(out2, ref2, atol=1e-4, rtol=1e-4), (out2, ref2)

    # 128-aligned 2N (2176): multi-step reduction with a ragged last block,
    # lane-chunk folding accumulator, ragged batch block (b=20 -> tb=16).
    B3, N3 = 20, 1088
    pred3 = jax.random.normal(ks[4], (B3, N3, 2), dtype=jnp.float32)
    loc3 = jax.random.uniform(ks[5], (B3, N3, 2), dtype=jnp.float32) * img
    out3 = jax.block_until_ready(location_loss(pred3, loc3, w=W, h=H))
    ref3 = _reference(pred3, loc3, w=W, h=H)
    assert out3.shape == (B3,)
    assert jnp.allclose(out3, ref3, atol=1e-4, rtol=1e-4), (out3, ref3)

    print("KERNEL_OK")
</pallas_src>

<mosaic_0001>
module attributes {stable_mosaic.version = 11 : i64} {
  func.func @_location_loss_kernel(%arg0: i32, %arg1: i32, %arg2: memref<2x16xf32, #tpu.memory_space<vmem>>, %arg3: memref<2x16xf32, #tpu.memory_space<vmem>>, %arg4: memref<2x1xf32, #tpu.memory_space<vmem>>, %arg5: memref<2x1xf32, #tpu.memory_space<vmem>>) attributes {dimension_semantics = [#tpu.dimension_semantics<parallel>, #tpu.dimension_semantics<arbitrary>], iteration_bounds = array<i64: 1, 1>, scalar_prefetch = 0 : i64, scratch_operands = 1 : i64, tpu.core_type = #tpu.core_type<tc>, window_params = [{transform_indices = @transform_0, window_bounds = array<i64: 2, 16>}, {transform_indices = @transform_1, window_bounds = array<i64: 2, 16>}, {transform_indices = @transform_2, window_bounds = array<i64: 2, 1>}]} {
    %c0 = arith.constant 0 : index
    %c0_0 = arith.constant 0 : index
    %0 = vector.load %arg2[%c0, %c0_0] : memref<2x16xf32, #tpu.memory_space<vmem>>, vector<2x16xf32>
    %c0_1 = arith.constant 0 : index
    %c0_2 = arith.constant 0 : index
    %1 = vector.load %arg3[%c0_1, %c0_2] : memref<2x16xf32, #tpu.memory_space<vmem>>, vector<2x16xf32>
    %2 = tpu.iota {dimensions = array<i32: 1>} : vector<2x16xi32>
    %c1_i32 = arith.constant 1 : i32
    %3 = vector.broadcast %c1_i32 : i32 to vector<2x16xi32>
    %4 = arith.andi %2, %3 : vector<2x16xi32>
    %c0_i32 = arith.constant 0 : i32
    %5 = vector.broadcast %c0_i32 : i32 to vector<2x16xi32>
    %6 = arith.cmpi eq, %4, %5 : vector<2x16xi32>
    %cst = arith.constant 0.00520833349 : f32
    %cst_3 = arith.constant 1.250000e-02 : f32
    %7 = vector.broadcast %cst : f32 to vector<2x16xf32>
    %8 = vector.broadcast %cst_3 : f32 to vector<2x16xf32>
    %9 = arith.select %6, %7, %8 : vector<2x16xi1>, vector<2x16xf32>
    %10 = arith.mulf %1, %9 : vector<2x16xf32>
    %cst_4 = arith.constant 1.000000e+00 : f32
    %11 = vector.broadcast %cst_4 : f32 to vector<2x16xf32>
    %12 = arith.subf %10, %11 : vector<2x16xf32>
    %13 = arith.subf %0, %12 : vector<2x16xf32>
    %14 = math.absf %13 : vector<2x16xf32>
    %c0_i32_5 = arith.constant 0 : i32
    %15 = arith.cmpi eq, %arg1, %c0_i32_5 : i32
    %16 = arith.extui %15 : i1 to i32
    %c0_i32_6 = arith.constant 0 : i32
    %17 = arith.cmpi ne, %16, %c0_i32_6 : i32
    scf.if %17 {
      %cst_14 = arith.constant 0.000000e+00 : f32
      %26 = vector.broadcast %cst_14 : f32 to vector<2x1xf32>
      %c0_15 = arith.constant 0 : index
      %c0_16 = arith.constant 0 : index
      %27 = vector.load %arg5[%c0_15, %c0_16] : memref<2x1xf32, #tpu.memory_space<vmem>>, vector<2x1xf32>
      tpu.vector_store %arg5[%c0_15, %c0_16], %26 {strides = array<i32>} : memref<2x1xf32, #tpu.memory_space<vmem>>, vector<2x1xf32>,
    } else {
    }
    %c0_7 = arith.constant 0 : index
    %c0_8 = arith.constant 0 : index
    %18 = vector.load %arg5[%c0_7, %c0_8] : memref<2x1xf32, #tpu.memory_space<vmem>>, vector<2x1xf32>
    %cst_9 = arith.constant dense<0.000000e+00> : vector<2xf32>
    %19 = vector.multi_reduction <add>, %14, %cst_9 [1] : vector<2x16xf32> to vector<2xf32>
    %20 = vector.shape_cast %19 : vector<2xf32> to vector<2x1xf32>
    %21 = arith.addf %18, %20 : vector<2x1xf32>
    %c0_10 = arith.constant 0 : index
    %c0_11 = arith.constant 0 : index
    %22 = vector.load %arg5[%c0_10, %c0_11] : memref<2x1xf32, #tpu.memory_space<vmem>>, vector<2x1xf32>
    tpu.vector_store %arg5[%c0_10, %c0_11], %21 {strides = array<i32>} : memref<2x1xf32, #tpu.memory_space<vmem>>, vector<2x1xf32>,
    %c0_i32_12 = arith.constant 0 : i32
    %23 = arith.cmpi eq, %arg1, %c0_i32_12 : i32
    %24 = arith.extui %23 : i1 to i32
    %c0_i32_13 = arith.constant 0 : i32
    %25 = arith.cmpi ne, %24, %c0_i32_13 : i32
    scf.if %25 {
      %c0_14 = arith.constant 0 : index
      %c0_15 = arith.constant 0 : index
      %26 = vector.load %arg5[%c0_14, %c0_15] : memref<2x1xf32, #tpu.memory_space<vmem>>, vector<2x1xf32>
      %cst_16 = arith.constant 6.250000e-02 : f32
      %27 = vector.broadcast %cst_16 : f32 to vector<2x1xf32>
      %28 = arith.mulf %26, %27 : vector<2x1xf32>
      %c0_17 = arith.constant 0 : index
      %c0_18 = arith.constant 0 : index
      %29 = vector.load %arg4[%c0_17, %c0_18] : memref<2x1xf32, #tpu.memory_space<vmem>>, vector<2x1xf32>
      tpu.vector_store %arg4[%c0_17, %c0_18], %28 {strides = array<i32>} : memref<2x1xf32, #tpu.memory_space<vmem>>, vector<2x1xf32>,
    } else {
    }
    return
  }
  func.func @transform_0(%arg0: i32, %arg1: i32) -> (i32, i32) {
    %c0_i32 = arith.constant 0 : i32
    return %arg0, %arg1 : i32, i32
  }
  func.func @transform_1(%arg0: i32, %arg1: i32) -> (i32, i32) {
    %c0_i32 = arith.constant 0 : i32
    return %arg0, %arg1 : i32, i32
  }
  func.func @transform_2(%arg0: i32, %arg1: i32) -> (i32, i32) {
    %c0_i32 = arith.constant 0 : i32
    %c0_i32_0 = arith.constant 0 : i32
    return %arg0, %c0_i32 : i32, i32
  }
}

</mosaic_0001>

<bundles_post_ra>
// kernel: tpu_custom_call.1
= control target key start
LH: loop header
LB: loop body
LE: loop exit
PB: predicated region body
PF: predicated region fallthrough
CT: control target
= control target key end

     0   :  { %7 = vsyncpa [#allocation4], 0  ;;  %s164_s0 = inlined_call_operand.hbm [shape: f32[2,16], index: 0, kind: input, shape index: {}]   ;;  %s165_s1 = inlined_call_operand.hbm [shape: f32[2,16], index: 1, kind: input, shape index: {}]   ;;  %s166_s2 = inlined_call_operand.vmem [shape: f32[2,1], index: 2, kind: output, shape index: {}]  }
   0x1   :  { %s14_s11 = sshll.u32 %s164_s0, 4  ;;  %s15_s11 = int_to_ptr.hbm [resolvable:$true] %s14_s11 }
   0x2   :  { %8 = vsyncpa [#allocation6], 0  ;;  %s133_s12 = smov [#allocation3]   ;;  %s25_s16 = sshll.u32 %s165_s1, 4  ;;  %s26_s16 = int_to_ptr.hbm [resolvable:$true] %s25_s16 }
   0x3   :  { %s16_s13 = sshll.u32 %s133_s12, 4  ;;  %s134_s17 = smov [#allocation5]   ;;  %s17_s13 = int_to_ptr.vmem [resolvable:$true] %s16_s13 }
   0x4   :  { %19 = dma.hbm_to_vmem [thread:$0]  %s15_s11, 32, %s17_s13, [#allocation4]  }
   0x5   :  { %s27_s18 = sshll.u32 %s134_s17, 4  ;;  %s28_s18 = int_to_ptr.vmem [resolvable:$true] %s27_s18 }
   0x6   :  { %30 = dma.hbm_to_vmem [thread:$0]  %s26_s16, 32, %s28_s18, [#allocation6]  }
   0x7   :  { %129 = dma.done.wait [#allocation4], 32  }
   0x8   :  { %130 = vsyncadd [#allocation4], 4294967264 }
   0x9   :  { %131 = dma.done.wait [#allocation6], 32  }
   0xa   :  { %132 = vsyncadd [#allocation6], 4294967264  ;;  %vm54_vm0 = vcmask 1024   ;;  %v41_v0 = vlaneseq  ;;  %v135_v1 = vmov 0.0   ;;  %v40_v4 = vld [vmem:[#allocation5] sm:$0x3] }
   0xb   :  { %55 = vst.msk [vmem:[#allocation2] sm:$0x3] %vm54_vm0, %v135_v1  ;;  %v136_v5 = vmov 0.0125   ;;  %v39_v8 = vld [vmem:[#allocation3] sm:$0x3] }
   0xc   :  { %v42_v2 = vand.u32 127, %v41_v0  ;;  %vm57_vm2 = vcmask 123904  }
   0xe   :  { %v43_v3 = vand.u32 1, %v42_v2 }
  0x10   :  { %vm44_vm1 = vcmp.eq.s32.totalorder %v43_v3, 0 }
  0x11   :  { %v45_v6 = vsel %vm44_vm1, 0.0052083335, %v136_v5 }
  0x12   :  { %v46_v7 = vmul.f32 %v45_v6, %v40_v4  ;;  %v56_v13 = vld [vmem:[#allocation2] sm:$0x3] }
  0x14   :  { %v76_v9 = vadd.f32 -1.0, %v46_v7 }
  0x16   :  { %v48_v10 = vsub.f32 %v39_v8, %v76_v9 }
  0x18   :  { %v49_v11 = vand.u32 2147483647, %v48_v10 }
  0x1a   :  { %v58_v12 = vsel %vm57_vm2, %v49_v11, 0.0 }
  0x1b   :  { %59 = vadd.xlane.f32.xlu0 %v58_v12 }
  0x8e   :  { %v60_v14 = vpop.xlane.xlu0 %59 }
  0x8f   :  { %v61_v15 = vadd.f32 %v60_v14, %v56_v13 }
  0x91   :  { %63 = vst.msk [vmem:[#allocation2] sm:$0x3] %vm54_vm0, %v61_v15 }
  0x98   :  { %v67_v16 = vld [vmem:[#allocation2] sm:$0x3] }
  0x99   :  { %v68_v17 = vmul.f32 0.0625, %v67_v16 }
  0x9b   :  { %69 = vst.msk [vmem:[%s166_s2] sm:$0x3] %vm54_vm0, %v68_v17 }
  0x9c   :  { %74 = vsyncpa [#allocation4], 1 }
  0x9d   :  { %75 = vsyncpa [#allocation6], 1 }

</bundles_post_ra>
